<compile_context>
chip_gen: v7x
topology: tpu7x:2x2x1
jax: 0.10.0
libtpu: 0.0.40
codegen_flags: <defaults>
</compile_context>

<pallas_src>
import functools

import jax
import jax.numpy as jnp
from jax.experimental import pallas as pl
from jax.experimental.pallas import tpu as pltpu

ALPHA = 1e-07
LANE = 128
SUBLANE = 8
TARGET_TILE_ROWS = 4096          # 4096x128xf32 = 2 MiB per input per buffer
VMEM_LIMIT_BYTES = 32 * 1024 * 1024


def _chip_info():
    """Best-effort (tensorcores_per_device, is_v7x). Conservative fallback = 1 TC."""
    try:
        kind = jax.devices()[0].device_kind.lower()
    except Exception:
        return 1, False
    is_v7 = "v7" in kind
    multi_tc = is_v7 or "v4" in kind or "v5p" in kind
    return (2 if multi_tc else 1), is_v7


def _silog_kernel(x_ref, t_ref, sum_ref, sq_ref, *,
                  rows, tile_rows, n_row_blocks, num_splits, tiles_per_split):
    if num_splits == 1:
        i = pl.program_id(0)
        b = i
    else:
        s = pl.program_id(0)      # core-split axis
        i = pl.program_id(1)      # streaming axis ("arbitrary")
        b = s * tiles_per_split + i

    @pl.when(i == 0)
    def _init():
        sum_ref[...] = jnp.zeros_like(sum_ref)
        sq_ref[...] = jnp.zeros_like(sq_ref)

    def accumulate(valid_rows):
        x = x_ref[...].astype(jnp.float32)
        t = t_ref[...].astype(jnp.float32)
        # One log + one divide (EUP recip + VPU mul) instead of two logs.
        g = jnp.log((x + ALPHA) / (t + ALPHA))
        if valid_rows is not None:
            # Row-granular tail mask.  The wrapper's 1.0-padding already gives
            # g == 0, so only the Pallas OOB rows of the partial edge tile need
            # zeroing.  Mask applied to g BEFORE squaring/accumulation.
            rid = jax.lax.broadcasted_iota(jnp.int32, (tile_rows, LANE), 0)
            g = jnp.where(rid < valid_rows, g, 0.0)
        # Fold (tile_rows,128) into the resident (1,8,128) accumulators with
        # pure VPU vreg adds (no per-step cross-lane/XLU or scalar RMW).
        gr = g.reshape(tile_rows // SUBLANE, SUBLANE, LANE)
        sum_ref[...] += jnp.sum(gr, axis=0, keepdims=True)
        sq_ref[...] += jnp.sum(gr * gr, axis=0, keepdims=True)

    last = n_row_blocks - 1
    rem_rows = rows - last * tile_rows            # static, in (0, tile_rows]
    needs_mask = rem_rows != tile_rows            # static
    exact_grid = (num_splits == 1) or (n_row_blocks % num_splits == 0)

    if (not needs_mask) and exact_grid:
        accumulate(None)                          # fast path: no mask, no dead steps
    elif needs_mask:
        @pl.when(b == last)
        def _tail():
            accumulate(rem_rows)

        @pl.when(b < last)
        def _full():
            accumulate(None)
    else:
        # Full tiles everywhere; only skip the (clamped-DMA) dead steps that a
        # ragged multi-core split can create.
        @pl.when(b < n_row_blocks)
        def _full():
            accumulate(None)


def silog_loss(pred, target, beta=0.25):
    """SILog loss. pred: [B,1,H,W]; target: [B,1,H,W] or [B,H,W]. Returns scalar f32."""
    if target.ndim == 3:
        target = target[:, None]                  # unsqueeze channel, matches torch path
    assert pred.shape[-2:] == target.shape[-2:], (
        "interpolation path not handled in-kernel")

    x = pred.reshape(-1)
    t = target.reshape(-1)
    n = x.shape[0]

    # Hot path: typical depth maps have n % 1024 == 0 -> pure reshape, no copy.
    # Otherwise pad to a multiple of 8*128 with 1.0 on BOTH inputs: there
    # g = log((1+a)/(1+a)) = 0 exactly, so no in-kernel mask is needed for it
    # and it never counts toward n.
    block = SUBLANE * LANE
    rem = n % block
    if rem:
        pad = block - rem
        x = jnp.pad(x, (0, pad), constant_values=1.0)
        t = jnp.pad(t, (0, pad), constant_values=1.0)

    rows = x.shape[0] // LANE                     # multiple of 8
    x2 = x.reshape(rows, LANE)
    t2 = t.reshape(rows, LANE)

    tile_rows = min(TARGET_TILE_ROWS, rows)       # multiple of 8
    n_row_blocks = pl.cdiv(rows, tile_rows)

    num_tc, is_v7 = _chip_info()
    num_splits = min(num_tc, n_row_blocks)        # 1 on v5e/v6e -> no dead steps

    if num_splits == 1:
        grid = (n_row_blocks,)
        tiles_per_split = n_row_blocks
        in_map = lambda i: (i, 0)
        out_map = lambda i: (0, 0, 0)
        semantics = ("arbitrary",)
    else:
        tiles_per_split = pl.cdiv(n_row_blocks, num_splits)
        grid = (num_splits, tiles_per_split)

        def in_map(s, i):
            b = s * tiles_per_split + i
            return (jnp.minimum(b, n_row_blocks - 1), 0)   # clamp dead-step DMA

        out_map = lambda s, i: (s, 0, 0)
        if is_v7 and hasattr(pltpu, "CORE_PARALLEL"):
            # Make the 2-TensorCore split real on v7x.
            semantics = (pltpu.CORE_PARALLEL, pltpu.ARBITRARY)
        else:
            semantics = ("parallel", "arbitrary")  # megacore (v4/v5p)

    kernel = functools.partial(
        _silog_kernel, rows=rows, tile_rows=tile_rows,
        n_row_blocks=n_row_blocks, num_splits=num_splits,
        tiles_per_split=tiles_per_split)

    bytes_in = x2.size * x2.dtype.itemsize + t2.size * t2.dtype.itemsize
    bytes_out = 2 * num_splits * SUBLANE * LANE * 4
    cost = pl.CostEstimate(flops=6 * x2.size,
                           transcendentals=2 * x2.size,
                           bytes_accessed=bytes_in + bytes_out)

    sum_parts, sq_parts = pl.pallas_call(
        kernel,
        out_shape=(
            jax.ShapeDtypeStruct((num_splits, SUBLANE, LANE), jnp.float32),
            jax.ShapeDtypeStruct((num_splits, SUBLANE, LANE), jnp.float32),
        ),
        grid_spec=pltpu.PrefetchScalarGridSpec(
            num_scalar_prefetch=0,
            grid=grid,
            in_specs=[
                pl.BlockSpec((tile_rows, LANE), in_map),
                pl.BlockSpec((tile_rows, LANE), in_map),
            ],
            out_specs=[
                pl.BlockSpec((1, SUBLANE, LANE), out_map),
                pl.BlockSpec((1, SUBLANE, LANE), out_map),
            ],
        ),
        compiler_params=pltpu.CompilerParams(
            dimension_semantics=semantics,
            vmem_limit_bytes=VMEM_LIMIT_BYTES),
        cost_estimate=cost,
    )(x2, t2)

    # Tiny final reduction + loss math (2 * num_splits * 8 * 128 floats).
    s = jnp.sum(sum_parts)
    sq = jnp.sum(sq_parts)
    n_f = jnp.float32(n)
    mean_g = s / n_f
    # torch.var default: unbiased (divide by N-1); n == 1 gives NaN exactly as
    # torch does.  Clamp tiny negatives from single-pass cancellation.
    var_g = jnp.maximum((sq - s * s / n_f) / (n_f - 1.0), 0.0)
    dg = var_g + jnp.float32(beta) * mean_g * mean_g
    return 10.0 * jnp.sqrt(dg)


def _silog_ref(pred, target, beta=0.25):
    if target.ndim == 3:
        target = target[:, None]
    g = jnp.log(pred.astype(jnp.float32) + ALPHA) - jnp.log(
        target.astype(jnp.float32) + ALPHA)
    g = g.reshape(-1)
    n = g.shape[0]
    var_g = jnp.sum((g - jnp.mean(g)) ** 2) / (n - 1)   # unbiased, like torch.var
    dg = var_g + beta * jnp.mean(g) ** 2
    return 10.0 * jnp.sqrt(dg)


if __name__ == "__main__":
    key = jax.random.PRNGKey(0)
    k1, k2, k3, k4 = jax.random.split(key, 4)

    # Primary small test: B=2, C=1, H=16, W=16; target given as [B,H,W].
    B, C, H, W = 2, 1, 16, 16
    pred = jax.random.uniform(k1, (B, C, H, W), jnp.float32, 0.1, 10.0)   # positive depths
    target = jax.random.uniform(k2, (B, H, W), jnp.float32, 0.1, 10.0)
    loss = jax.block_until_ready(silog_loss(pred, target, beta=0.25))
    ref = _silog_ref(pred, target, beta=0.25)
    assert jnp.allclose(loss, ref, rtol=1e-4, atol=1e-5), (loss, ref)

    # Secondary check: multi-tile stream with a ragged last tile (exercises the
    # pl.when-gated row mask and multi-step accumulation).
    B2, H2, W2 = 2, 321, 1024          # n = 657408 -> rows = 5136 -> 2 tiles of 4096
    pred2 = jax.random.uniform(k3, (B2, 1, H2, W2), jnp.float32, 0.1, 10.0)
    target2 = jax.random.uniform(k4, (B2, H2, W2), jnp.float32, 0.1, 10.0)
    loss2 = jax.block_until_ready(silog_loss(pred2, target2, beta=0.25))
    ref2 = _silog_ref(pred2, target2, beta=0.25)
    assert jnp.allclose(loss2, ref2, rtol=2e-3, atol=1e-3), (loss2, ref2)

    print("KERNEL_OK")
</pallas_src>

<mosaic_0001>
module attributes {stable_mosaic.version = 11 : i64} {
  func.func @_silog_kernel(%arg0: i32, %arg1: memref<8x128xf32, #tpu.memory_space<vmem>>, %arg2: memref<8x128xf32, #tpu.memory_space<vmem>>, %arg3: memref<1x8x128xf32, #tpu.memory_space<vmem>>, %arg4: memref<1x8x128xf32, #tpu.memory_space<vmem>>) attributes {dimension_semantics = [#tpu.dimension_semantics<arbitrary>], iteration_bounds = array<i64: 1>, scalar_prefetch = 0 : i64, scratch_operands = 0 : i64, tpu.core_type = #tpu.core_type<tc>, window_params = [{transform_indices = @transform_0, window_bounds = array<i64: 8, 128>}, {transform_indices = @transform_1, window_bounds = array<i64: 8, 128>}, {pipeline_mode = #tpu.pipeline_mode<synchronous>, transform_indices = @transform_2, window_bounds = array<i64: 1, 8, 128>}, {pipeline_mode = #tpu.pipeline_mode<synchronous>, transform_indices = @transform_3, window_bounds = array<i64: 1, 8, 128>}]} {
    %c0_i32 = arith.constant 0 : i32
    %0 = arith.cmpi eq, %arg0, %c0_i32 : i32
    %1 = arith.extui %0 : i1 to i32
    %c0_i32_0 = arith.constant 0 : i32
    %2 = arith.cmpi ne, %1, %c0_i32_0 : i32
    scf.if %2 {
      %cst_19 = arith.constant 0.000000e+00 : f32
      %23 = vector.broadcast %cst_19 : f32 to vector<1x8x128xf32>
      %c0_20 = arith.constant 0 : index
      %c0_21 = arith.constant 0 : index
      %c0_22 = arith.constant 0 : index
      %24 = vector.load %arg3[%c0_20, %c0_21, %c0_22] : memref<1x8x128xf32, #tpu.memory_space<vmem>>, vector<1x8x128xf32>
      tpu.vector_store %arg3[%c0_20, %c0_21, %c0_22], %23 {strides = array<i32>} : memref<1x8x128xf32, #tpu.memory_space<vmem>>, vector<1x8x128xf32>,
      %cst_23 = arith.constant 0.000000e+00 : f32
      %25 = vector.broadcast %cst_23 : f32 to vector<1x8x128xf32>
      %c0_24 = arith.constant 0 : index
      %c0_25 = arith.constant 0 : index
      %c0_26 = arith.constant 0 : index
      %26 = vector.load %arg4[%c0_24, %c0_25, %c0_26] : memref<1x8x128xf32, #tpu.memory_space<vmem>>, vector<1x8x128xf32>
      tpu.vector_store %arg4[%c0_24, %c0_25, %c0_26], %25 {strides = array<i32>} : memref<1x8x128xf32, #tpu.memory_space<vmem>>, vector<1x8x128xf32>,
    } else {
    }
    %c0 = arith.constant 0 : index
    %c0_1 = arith.constant 0 : index
    %3 = vector.load %arg1[%c0, %c0_1] : memref<8x128xf32, #tpu.memory_space<vmem>>, vector<8x128xf32>
    %c0_2 = arith.constant 0 : index
    %c0_3 = arith.constant 0 : index
    %4 = vector.load %arg2[%c0_2, %c0_3] : memref<8x128xf32, #tpu.memory_space<vmem>>, vector<8x128xf32>
    %cst = arith.constant 1.000000e-07 : f32
    %5 = vector.broadcast %cst : f32 to vector<8x128xf32>
    %6 = arith.addf %3, %5 : vector<8x128xf32>
    %cst_4 = arith.constant 1.000000e-07 : f32
    %7 = vector.broadcast %cst_4 : f32 to vector<8x128xf32>
    %8 = arith.addf %4, %7 : vector<8x128xf32>
    %9 = arith.divf %6, %8 : vector<8x128xf32>
    %10 = math.log %9 : vector<8x128xf32>
    %11 = vector.shape_cast %10 : vector<8x128xf32> to vector<1x8x128xf32>
    %c0_5 = arith.constant 0 : index
    %c0_6 = arith.constant 0 : index
    %c0_7 = arith.constant 0 : index
    %12 = vector.load %arg3[%c0_5, %c0_6, %c0_7] : memref<1x8x128xf32, #tpu.memory_space<vmem>>, vector<1x8x128xf32>
    %cst_8 = arith.constant dense<0.000000e+00> : vector<8x128xf32>
    %13 = vector.multi_reduction <add>, %11, %cst_8 [0] : vector<1x8x128xf32> to vector<8x128xf32>
    %14 = vector.shape_cast %13 : vector<8x128xf32> to vector<1x8x128xf32>
    %15 = arith.addf %12, %14 : vector<1x8x128xf32>
    %c0_9 = arith.constant 0 : index
    %c0_10 = arith.constant 0 : index
    %c0_11 = arith.constant 0 : index
    %16 = vector.load %arg3[%c0_9, %c0_10, %c0_11] : memref<1x8x128xf32, #tpu.memory_space<vmem>>, vector<1x8x128xf32>
    tpu.vector_store %arg3[%c0_9, %c0_10, %c0_11], %15 {strides = array<i32>} : memref<1x8x128xf32, #tpu.memory_space<vmem>>, vector<1x8x128xf32>,
    %c0_12 = arith.constant 0 : index
    %c0_13 = arith.constant 0 : index
    %c0_14 = arith.constant 0 : index
    %17 = vector.load %arg4[%c0_12, %c0_13, %c0_14] : memref<1x8x128xf32, #tpu.memory_space<vmem>>, vector<1x8x128xf32>
    %18 = arith.mulf %11, %11 : vector<1x8x128xf32>
    %cst_15 = arith.constant dense<0.000000e+00> : vector<8x128xf32>
    %19 = vector.multi_reduction <add>, %18, %cst_15 [0] : vector<1x8x128xf32> to vector<8x128xf32>
    %20 = vector.shape_cast %19 : vector<8x128xf32> to vector<1x8x128xf32>
    %21 = arith.addf %17, %20 : vector<1x8x128xf32>
    %c0_16 = arith.constant 0 : index
    %c0_17 = arith.constant 0 : index
    %c0_18 = arith.constant 0 : index
    %22 = vector.load %arg4[%c0_16, %c0_17, %c0_18] : memref<1x8x128xf32, #tpu.memory_space<vmem>>, vector<1x8x128xf32>
    tpu.vector_store %arg4[%c0_16, %c0_17, %c0_18], %21 {strides = array<i32>} : memref<1x8x128xf32, #tpu.memory_space<vmem>>, vector<1x8x128xf32>,
    return
  }
  func.func @transform_0(%arg0: i32) -> (i32, i32) {
    %c0_i32 = arith.constant 0 : i32
    %c0_i32_0 = arith.constant 0 : i32
    return %arg0, %c0_i32 : i32, i32
  }
  func.func @transform_1(%arg0: i32) -> (i32, i32) {
    %c0_i32 = arith.constant 0 : i32
    %c0_i32_0 = arith.constant 0 : i32
    return %arg0, %c0_i32 : i32, i32
  }
  func.func @transform_2(%arg0: i32) -> (i32, i32, i32) {
    %c0_i32 = arith.constant 0 : i32
    %c0_i32_0 = arith.constant 0 : i32
    %c0_i32_1 = arith.constant 0 : i32
    %c0_i32_2 = arith.constant 0 : i32
    return %c0_i32, %c0_i32_0, %c0_i32_1 : i32, i32, i32
  }
  func.func @transform_3(%arg0: i32) -> (i32, i32, i32) {
    %c0_i32 = arith.constant 0 : i32
    %c0_i32_0 = arith.constant 0 : i32
    %c0_i32_1 = arith.constant 0 : i32
    %c0_i32_2 = arith.constant 0 : i32
    return %c0_i32, %c0_i32_0, %c0_i32_1 : i32, i32, i32
  }
}

</mosaic_0001>

<bundles_post_ra>
// kernel: tpu_custom_call.1
= control target key start
LH: loop header
LB: loop body
LE: loop exit
PB: predicated region body
PF: predicated region fallthrough
CT: control target
= control target key end

     0   :  { %9 = vsyncpa [#allocation3], 0  ;;  %s269_s0 = inlined_call_operand.hbm [shape: f32[8,128], index: 0, kind: input, shape index: {}]   ;;  %s270_s1 = inlined_call_operand.hbm [shape: f32[8,128], index: 1, kind: input, shape index: {}]   ;;  %s271_s2 = inlined_call_operand.hbm [shape: f32[1,8,128], index: 2, kind: output, shape index: {0}]   ;;  %s272_s3 = inlined_call_operand.hbm [shape: f32[1,8,128], index: 3, kind: output, shape index: {1}]  }
   0x1   :  { %10 = vsyncpa [#allocation6], 0 }
   0x2   :  { %11 = vsyncpa [#allocation4], 0 }
   0x3   :  { %12 = vsyncpa [#allocation9], 0  ;;  %s197_s12 = smov [#allocation2]   ;;  %s198_s14 = smov [#allocation5]  }
   0x4   :  { %s19_s13 = sshll.u32 %s197_s12, 4  ;;  %s29_s15 = sshll.u32 %s198_s14, 4  ;;  %s20_s13 = int_to_ptr.vmem [resolvable:$true] %s19_s13  ;;  %s30_s15 = int_to_ptr.vmem [resolvable:$true] %s29_s15 }
   0x5   :  { %s101_s18 = scalar_lea.hbm %s269_s0, 128 }
   0x6   :  { %p102_p0 = scmp.ne.s32.totalorder %s269_s0, %s101_s18  ;;  %p105_p1 = scmp.lt.u32.totalorder %s101_s18, %s269_s0 }
   0x8   :  { %p107_p2 = pnand %p105_p1, %p102_p0 }
   0xa   :  { %110 = shalt.err (!%p107_p2)
}
   0xb   :  { %s111_s23 = scalar_lea.vmem %s20_s13, 128  ;;  %p116_p4 = scmp.lt.s32.totalorder %s20_s13, %s20_s13 }
   0xc   :  { %p112_p3 = scmp.ne.s32.totalorder %s20_s13, %s111_s23  ;;  %p117_p5 = scmp.lt.s32.totalorder %s111_s23, %s111_s23 }
   0xe   :  { %p118_p6 = por %p117_p5, %p116_p4 }
  0x10   :  { %p119_p7 = pnand %p118_p6, %p112_p3 }
  0x12   :  { %122 = shalt.err (!%p119_p7)
}
  0x13   :  { %22 = dma.hbm_to_vmem [thread:$0]  %s269_s0, 128, %s20_s13, [#allocation3]  }
  0x14   :  { %s123_s28 = scalar_lea.hbm %s270_s1, 128 }
  0x15   :  { %p124_p8 = scmp.ne.s32.totalorder %s270_s1, %s123_s28  ;;  %p127_p9 = scmp.lt.u32.totalorder %s123_s28, %s270_s1 }
  0x17   :  { %p129_p10 = pnand %p127_p9, %p124_p8 }
  0x19   :  { %132 = shalt.err (!%p129_p10)
}
  0x1a   :  { %s133_s6 = scalar_lea.vmem %s30_s15, 128  ;;  %p138_p12 = scmp.lt.s32.totalorder %s30_s15, %s30_s15 }
  0x1b   :  { %p134_p11 = scmp.ne.s32.totalorder %s30_s15, %s133_s6  ;;  %p139_p13 = scmp.lt.s32.totalorder %s133_s6, %s133_s6 }
  0x1d   :  { %p140_p0 = por %p139_p13, %p138_p12 }
  0x1f   :  { %p141_p1 = pnand %p140_p0, %p134_p11 }
  0x21   :  { %144 = shalt.err (!%p141_p1)
}
  0x22   :  { %32 = dma.hbm_to_vmem [thread:$0]  %s270_s1, 128, %s30_s15, [#allocation6]  }
  0x23   :  { %189 = dma.done.wait [#allocation3], 128  }
  0x24   :  { %190 = vsyncadd [#allocation3], 4294967168 }
  0x25   :  { %191 = dma.done.wait [#allocation6], 128  }
  0x26   :  { %192 = vsyncadd [#allocation6], 4294967168  ;;  %v46_v0 = vld [vmem:[#allocation5] sm:$0xff]  ;;  %v45_v2 = vld [vmem:[#allocation2] sm:$0xff]  ;;  %s199_s8 = smov [#allocation7]   ;;  %s200_s10 = smov [#allocation8]  }
  0x27   :  { %v48_v1 = vadd.f32 1e-07, %v46_v0  ;;  %v47_v3 = vadd.f32 1e-07, %v45_v2  ;;  %s68_s9 = sshll.u32 %s199_s8, 4  ;;  %s78_s11 = sshll.u32 %s200_s10, 4  ;;  %s69_s9 = int_to_ptr.vmem [resolvable:$true] %s68_s9  ;;  %s79_s11 = int_to_ptr.vmem [resolvable:$true] %s78_s11 }
  0x28   :  { %s145_s1 = scalar_lea.vmem %s69_s9, 128  ;;  %p150_p3 = scmp.lt.s32.totalorder %s69_s9, %s69_s9 }
  0x29   :  { %97 = vrcp.f32 %v48_v1  ;;  %p146_p2 = scmp.ne.s32.totalorder %s69_s9, %s145_s1  ;;  %p151_p4 = scmp.lt.s32.totalorder %s145_s1, %s145_s1 }
  0x2b   :  { %p152_p5 = por %p151_p4, %p150_p3 }
  0x2d   :  { %p153_p6 = pnand %p152_p5, %p146_p2 }
  0x33   :  { %v98_v4 = vpop.eup %97 }
  0x34   :  { %v50_v5 = vmul.f32 %v98_v4, %v47_v3 }
  0x36   :  { %99 = vlog2.f32 %v50_v5 }
  0x40   :  { %v100_v6 = vpop.eup %99 }
  0x41   :  { %v52_v7 = vmul.f32 0.6931472, %v100_v6 }
  0x43   :  { %v58_v8 = vmul.f32 %v52_v7, %v52_v7  ;;  %56 = vst [vmem:[#allocation7] sm:$0xff] %v52_v7 }
  0x44   :  { %156 = shalt.err (!%p153_p6)
}
  0x45   :  { %s157_s14 = scalar_lea.hbm %s271_s2, 128 }
  0x46   :  { %p158_p7 = scmp.ne.s32.totalorder %s271_s2, %s157_s14  ;;  %p161_p8 = scmp.lt.u32.totalorder %s157_s14, %s271_s2 }
  0x48   :  { %p163_p9 = pnand %p161_p8, %p158_p7 }
  0x4a   :  { %166 = shalt.err (!%p163_p9)
}
  0x4b   :  { %71 = dma.vmem_to_hbm [thread:$0]  %s69_s9, 128, %s271_s2, [#allocation4]   ;;  %61 = vst [vmem:[#allocation8] sm:$0xff] %v58_v8 }
  0x4c   :  { %s167_s21 = scalar_lea.vmem %s79_s11, 128  ;;  %p172_p11 = scmp.lt.s32.totalorder %s79_s11, %s79_s11 }
  0x4d   :  { %p168_p10 = scmp.ne.s32.totalorder %s79_s11, %s167_s21  ;;  %p173_p12 = scmp.lt.s32.totalorder %s167_s21, %s167_s21 }
  0x4f   :  { %p174_p13 = por %p173_p12, %p172_p11 }
  0x51   :  { %p175_p0 = pnand %p174_p13, %p168_p10 }
  0x53   :  { %178 = shalt.err (!%p175_p0)
}
  0x54   :  { %s179_s24 = scalar_lea.hbm %s272_s3, 128 }
  0x55   :  { %p180_p1 = scmp.ne.s32.totalorder %s272_s3, %s179_s24  ;;  %p183_p2 = scmp.lt.u32.totalorder %s179_s24, %s272_s3 }
  0x57   :  { %p185_p3 = pnand %p183_p2, %p180_p1 }
  0x59   :  { %188 = shalt.err (!%p185_p3)
}
  0x5a   :  { %81 = dma.vmem_to_hbm [thread:$0]  %s79_s11, 128, %s272_s3, [#allocation9]  }
  0x5b   :  { %193 = dma.done.wait [#allocation4], 128  }
  0x5c   :  { %194 = vsyncadd [#allocation4], 4294967168 }
  0x5d   :  { %195 = dma.done.wait [#allocation9], 128  }
  0x5e   :  { %196 = vsyncadd [#allocation9], 4294967168 }
  0x5f   :  { %88 = vsyncpa [#allocation3], 1 }
  0x60   :  { %89 = vsyncpa [#allocation6], 1 }
  0x61   :  { %90 = vsyncpa [#allocation4], 1 }
  0x62   :  { %91 = vsyncpa [#allocation9], 1 }

</bundles_post_ra>
